<compile_context>
chip_gen: v5e
topology: v5e:2x2
jax: 0.10.0
libtpu: 0.0.40
codegen_flags: <defaults>
</compile_context>

<pallas_src>
import functools

import jax
import jax.numpy as jnp
import numpy as np
from jax.experimental import pallas as pl
from jax.experimental.pallas import tpu as pltpu


def _row_shift_in_batch(src, s, *, B, H):
    """out[b*H + h] = src[b*H + h + s] if 0 <= h + s < H else 0  (s is a static int).

    Implements the per-image height zero-padding of a 3x3 conv tap on the
    (B*H, W*C) row-stacked activation layout, without a padded scratch buffer.
    """
    if s == 0:
        return src
    L = src.shape[1]
    a = abs(s)
    pad = jnp.zeros((a, L), src.dtype)
    parts = []
    for b in range(B):                      # static, small (B <= 16)
        r0 = b * H
        if s > 0:                           # read rows below; zero-fill image bottom
            parts += [src[r0 + a:r0 + H, :], pad]
        else:                               # read rows above; zero-fill image top
            parts += [pad, src[r0:r0 + H - a, :]]
    return jnp.concatenate(parts, axis=0)


def _im2row(src, d, *, B, H):
    """(B*H, W*C) -> (B*H, 3*W*C): the 3 kh taps of a 3x3 conv (dilation d), lane-concat."""
    return jnp.concatenate(
        [_row_shift_in_batch(src, (kh - 1) * d, B=B, H=H) for kh in range(3)],
        axis=-1)


def _block_kernel(x_ref, w1_ref, b1_ref, w2_ref, b2_ref, o_ref, *, B, H, dil):
    x = x_ref[...]                                            # (B*H, W*C) f32

    # conv1 (3x3, pad 1) + bn1 (scale folded into w1) + relu : one MXU dot, K = 3*W*C
    lhs1 = _im2row(x, 1, B=B, H=H).astype(jnp.bfloat16)       # cast once per conv
    acc1 = jnp.dot(lhs1, w1_ref[...], preferred_element_type=jnp.float32)
    out1 = jnp.maximum(acc1 + b1_ref[...], 0.0)

    # conv2 (3x3, dilation=dil, pad=dil) + bn2 + identity residual + relu
    lhs2 = _im2row(out1, dil, B=B, H=H).astype(jnp.bfloat16)
    acc2 = jnp.dot(lhs2, w2_ref[...], preferred_element_type=jnp.float32)
    out2 = jnp.maximum(acc2 + b2_ref[...] + x, 0.0)

    o_ref[...] = out2.astype(o_ref.dtype)                     # full-lane unmasked stores


def _fold_conv3x3(w_hwio, scale, W_img, d):
    """(3,3,Cin,Cout) HWIO + per-channel BN scale -> (3*W*Cin, W*Cout) folded bf16 weight.

    The kw shift (width zero-padding masked in, so out-of-image taps are simply
    absent) and the Cin contraction are folded into the matmul K dimension; the
    kh shift is handled in-kernel by lane-concatenating 3 row-shifted activation
    copies.  BN scale is folded into the output columns.
    """
    KH, KW, Cin, Cout = w_hwio.shape
    w = np.asarray(w_hwio, np.float32) * np.asarray(scale, np.float32)[None, None, None, :]
    big = np.zeros((KH, W_img * Cin, W_img * Cout), np.float32)
    for kh in range(KH):
        for kw in range(KW):
            for wo in range(W_img):
                wi = wo + (kw - 1) * d
                if 0 <= wi < W_img:
                    big[kh, wi * Cin:(wi + 1) * Cin, wo * Cout:(wo + 1) * Cout] = w[kh, kw]
    return jnp.asarray(big.reshape(KH * W_img * Cin, W_img * Cout), jnp.bfloat16)


def _pick_batch_block(N, H, target_rows=256):
    """Largest divisor B of N with B*H <= target_rows, preferring >= 2 grid steps."""
    divisors = [b for b in range(1, N + 1) if N % b == 0]
    fitting = [b for b in divisors if b * H <= target_rows] or [1]
    multi = [b for b in fitting if N // b >= 2]
    return max(multi) if multi else max(fitting)


def basic_block_with_dilation(x_nhwc, w1_hwio, scale1, bias1, w2_hwio, scale2,
                              bias2, *, dilation, batch_block=None):
    """x_nhwc: (N,H,W,C); w*_hwio: (3,3,C,C); scale*/bias*: (C,) eval-mode folded BN."""
    N, H, W, Cin = x_nhwc.shape
    Cout = w1_hwio.shape[-1]
    # TODO(synk): stride>1 / downsample branch not implemented (identity residual only).
    assert Cin == Cout, "identity residual requires inplanes == planes (no downsample)"
    C = Cin
    WC = W * C
    assert WC % 128 == 0, "lane-dense layout requires W*C to be a multiple of 128"
    assert H % 8 == 0, "sublane-aligned blocks require H to be a multiple of 8"
    assert 1 <= dilation < H

    B = _pick_batch_block(N, H) if batch_block is None else batch_block
    assert N % B == 0 and B >= 1

    x2d = x_nhwc.reshape(N * H, WC)                       # rows = (n, h), lanes = w*C + c

    # Host-side (trace-time) weight folding; BN scale folded in before the bf16 cast.
    w1f = _fold_conv3x3(w1_hwio, scale1, W, 1)            # (3*WC, WC) bf16
    w2f = _fold_conv3x3(w2_hwio, scale2, W, dilation)     # (3*WC, WC) bf16
    b1 = jnp.tile(jnp.asarray(bias1, jnp.float32).reshape(1, C), (1, W))   # (1, WC)
    b2 = jnp.tile(jnp.asarray(bias2, jnp.float32).reshape(1, C), (1, W))   # (1, WC)

    kernel = functools.partial(_block_kernel, B=B, H=H, dil=dilation)

    out2d = pl.pallas_call(
        kernel,
        out_shape=jax.ShapeDtypeStruct((N * H, WC), x_nhwc.dtype),
        grid_spec=pltpu.PrefetchScalarGridSpec(
            num_scalar_prefetch=0,
            grid=(N // B,),
            in_specs=[
                pl.BlockSpec((B * H, WC), lambda i: (i, 0)),      # x  (B images stacked)
                pl.BlockSpec((3 * WC, WC), lambda i: (0, 0)),     # folded w1 (bf16)
                pl.BlockSpec((1, WC), lambda i: (0, 0)),          # bn1 bias (f32)
                pl.BlockSpec((3 * WC, WC), lambda i: (0, 0)),     # folded w2 (bf16)
                pl.BlockSpec((1, WC), lambda i: (0, 0)),          # bn2 bias (f32)
            ],
            out_specs=pl.BlockSpec((B * H, WC), lambda i: (i, 0)),
        ),
        compiler_params=pltpu.CompilerParams(
            dimension_semantics=("parallel",)),
    )(x2d, w1f, b1, w2f, b2)

    return out2d.reshape(N, H, W, C)


def _reference_nchw(x, w1_oihw, g1, be1, m1, v1, w2_oihw, g2, be2, m2, v2,
                    dilation, eps=1e-5):
    """Pure-JAX NCHW reference matching the PyTorch module (eval-mode BN), f32."""
    def bn(o, g, b, m, v):
        return (g[None, :, None, None] * (o - m[None, :, None, None])
                / jnp.sqrt(v[None, :, None, None] + eps)
                + b[None, :, None, None])

    out = jax.lax.conv_general_dilated(
        x, w1_oihw, window_strides=(1, 1), padding=((1, 1), (1, 1)),
        dimension_numbers=("NCHW", "OIHW", "NCHW"),
        precision=jax.lax.Precision.HIGHEST)
    out = jnp.maximum(bn(out, g1, be1, m1, v1), 0.0)
    out = jax.lax.conv_general_dilated(
        out, w2_oihw, window_strides=(1, 1),
        padding=((dilation, dilation), (dilation, dilation)),
        rhs_dilation=(dilation, dilation),
        dimension_numbers=("NCHW", "OIHW", "NCHW"),
        precision=jax.lax.Precision.HIGHEST)
    out = bn(out, g2, be2, m2, v2)
    return jnp.maximum(out + x, 0.0)


if __name__ == "__main__":
    N, C, Hs, Ws = 4, 8, 16, 16      # inplanes == planes == 8, stride=1, W*C = 128
    DIL = 2
    EPS = 1e-5

    key = jax.random.PRNGKey(0)
    ks = jax.random.split(key, 11)
    x_nchw = jax.random.normal(ks[0], (N, C, Hs, Ws), jnp.float32)

    # conv weights in PyTorch OIHW layout, deterministic init
    w1_oihw = 0.1 * jax.random.normal(ks[1], (C, C, 3, 3), jnp.float32)
    w2_oihw = 0.1 * jax.random.normal(ks[2], (C, C, 3, 3), jnp.float32)
    # BatchNorm params / running stats (eval-mode semantics)
    g1 = 0.5 + jax.random.uniform(ks[3], (C,), jnp.float32)
    be1 = 0.1 * jax.random.normal(ks[4], (C,), jnp.float32)
    m1 = 0.1 * jax.random.normal(ks[5], (C,), jnp.float32)
    v1 = 0.5 + jax.random.uniform(ks[6], (C,), jnp.float32)
    g2 = 0.5 + jax.random.uniform(ks[7], (C,), jnp.float32)
    be2 = 0.1 * jax.random.normal(ks[8], (C,), jnp.float32)
    m2 = 0.1 * jax.random.normal(ks[9], (C,), jnp.float32)
    v2 = 0.5 + jax.random.uniform(ks[10], (C,), jnp.float32)

    # Fold BN into per-channel scale/bias for the kernel.
    s1 = g1 / jnp.sqrt(v1 + EPS)
    b1 = be1 - m1 * s1
    s2 = g2 / jnp.sqrt(v2 + EPS)
    b2 = be2 - m2 * s2

    # NCHW -> NHWC for the kernel; OIHW -> HWIO for the weight folding.
    x_nhwc = jnp.transpose(x_nchw, (0, 2, 3, 1))
    w1_hwio = jnp.transpose(w1_oihw, (2, 3, 1, 0))
    w2_hwio = jnp.transpose(w2_oihw, (2, 3, 1, 0))

    out_nhwc = basic_block_with_dilation(
        x_nhwc, w1_hwio, s1, b1, w2_hwio, s2, b2, dilation=DIL)
    out_nchw = jnp.transpose(out_nhwc, (0, 3, 1, 2))
    jax.block_until_ready(out_nchw)

    ref = _reference_nchw(x_nchw, w1_oihw, g1, be1, m1, v1,
                          w2_oihw, g2, be2, m2, v2, DIL, EPS)
    # The kernel feeds the MXU bf16 operands (f32 accumulate / f32 epilogue), so
    # compare against the exact-f32 reference at bf16-level tolerance.
    np.testing.assert_allclose(np.asarray(out_nchw), np.asarray(ref),
                               rtol=2e-2, atol=3e-2)
    print("KERNEL_OK")
</pallas_src>

<mosaic_0001>
module attributes {stable_mosaic.version = 11 : i64} {
  func.func @_block_kernel(%arg0: i32, %arg1: memref<32x128xf32, #tpu.memory_space<vmem>>, %arg2: memref<384x128xbf16, #tpu.memory_space<vmem>>, %arg3: memref<1x128xf32, #tpu.memory_space<vmem>>, %arg4: memref<384x128xbf16, #tpu.memory_space<vmem>>, %arg5: memref<1x128xf32, #tpu.memory_space<vmem>>, %arg6: memref<32x128xf32, #tpu.memory_space<vmem>>) attributes {dimension_semantics = [#tpu.dimension_semantics<parallel>], iteration_bounds = array<i64: 2>, scalar_prefetch = 0 : i64, scratch_operands = 0 : i64, tpu.core_type = #tpu.core_type<tc>, window_params = [{transform_indices = @transform_0, window_bounds = array<i64: 32, 128>}, {pipeline_mode = #tpu.pipeline_mode<synchronous>, transform_indices = @transform_1, window_bounds = array<i64: 384, 128>}, {pipeline_mode = #tpu.pipeline_mode<synchronous>, transform_indices = @transform_2, window_bounds = array<i64: 1, 128>}, {pipeline_mode = #tpu.pipeline_mode<synchronous>, transform_indices = @transform_3, window_bounds = array<i64: 384, 128>}, {pipeline_mode = #tpu.pipeline_mode<synchronous>, transform_indices = @transform_4, window_bounds = array<i64: 1, 128>}, {transform_indices = @transform_5, window_bounds = array<i64: 32, 128>}]} {
    %c0 = arith.constant 0 : index
    %c0_0 = arith.constant 0 : index
    %0 = vector.load %arg1[%c0, %c0_0] : memref<32x128xf32, #tpu.memory_space<vmem>>, vector<32x128xf32>
    %cst = arith.constant 0.000000e+00 : f32
    %1 = vector.broadcast %cst : f32 to vector<1x128xf32>
    %2 = vector.extract_strided_slice %0 {offsets = [0, 0], sizes = [15, 128], strides = [1, 1]} : vector<32x128xf32> to vector<15x128xf32>
    %3 = vector.extract_strided_slice %0 {offsets = [16, 0], sizes = [15, 128], strides = [1, 1]} : vector<32x128xf32> to vector<15x128xf32>
    %4 = tpu.concatenate %1, %2, %1, %3 in 0 : vector<1x128xf32>, vector<15x128xf32>, vector<1x128xf32>, vector<15x128xf32> -> vector<32x128xf32>
    %cst_1 = arith.constant 0.000000e+00 : f32
    %5 = vector.broadcast %cst_1 : f32 to vector<1x128xf32>
    %6 = vector.extract_strided_slice %0 {offsets = [1, 0], sizes = [15, 128], strides = [1, 1]} : vector<32x128xf32> to vector<15x128xf32>
    %7 = vector.extract_strided_slice %0 {offsets = [17, 0], sizes = [15, 128], strides = [1, 1]} : vector<32x128xf32> to vector<15x128xf32>
    %8 = tpu.concatenate %6, %5, %7, %5 in 0 : vector<15x128xf32>, vector<1x128xf32>, vector<15x128xf32>, vector<1x128xf32> -> vector<32x128xf32>
    %9 = tpu.concatenate %4, %0, %8 in 1 : vector<32x128xf32>, vector<32x128xf32>, vector<32x128xf32> -> vector<32x384xf32>
    %10 = arith.truncf %9 : vector<32x384xf32> to vector<32x384xbf16>
    %c0_2 = arith.constant 0 : index
    %c0_3 = arith.constant 0 : index
    %11 = vector.load %arg2[%c0_2, %c0_3] : memref<384x128xbf16, #tpu.memory_space<vmem>>, vector<384x128xbf16>
    %cst_4 = arith.constant dense<0.000000e+00> : vector<32x128xf32>
    %12 = tpu.matmul %10, %11, %cst_4 {dimension_numbers = #tpu.dot_dimension_numbers<[1], [0], [0], [1], [0, 0, 1, 1], [], []>} : vector<32x384xbf16>, vector<384x128xbf16>, vector<32x128xf32> -> vector<32x128xf32>
    %c0_5 = arith.constant 0 : index
    %c0_6 = arith.constant 0 : index
    %13 = vector.load %arg3[%c0_5, %c0_6] : memref<1x128xf32, #tpu.memory_space<vmem>>, vector<1x128xf32>
    %14 = vector.broadcast %13 : vector<1x128xf32> to vector<32x128xf32>
    %15 = arith.addf %12, %14 : vector<32x128xf32>
    %cst_7 = arith.constant 0.000000e+00 : f32
    %16 = vector.broadcast %cst_7 : f32 to vector<32x128xf32>
    %17 = arith.maximumf %15, %16 : vector<32x128xf32>
    %cst_8 = arith.constant 0.000000e+00 : f32
    %18 = vector.broadcast %cst_8 : f32 to vector<2x128xf32>
    %19 = vector.extract_strided_slice %17 {offsets = [0, 0], sizes = [14, 128], strides = [1, 1]} : vector<32x128xf32> to vector<14x128xf32>
    %20 = vector.extract_strided_slice %17 {offsets = [16, 0], sizes = [14, 128], strides = [1, 1]} : vector<32x128xf32> to vector<14x128xf32>
    %21 = tpu.concatenate %18, %19, %18, %20 in 0 : vector<2x128xf32>, vector<14x128xf32>, vector<2x128xf32>, vector<14x128xf32> -> vector<32x128xf32>
    %cst_9 = arith.constant 0.000000e+00 : f32
    %22 = vector.broadcast %cst_9 : f32 to vector<2x128xf32>
    %23 = vector.extract_strided_slice %17 {offsets = [2, 0], sizes = [14, 128], strides = [1, 1]} : vector<32x128xf32> to vector<14x128xf32>
    %24 = vector.extract_strided_slice %17 {offsets = [18, 0], sizes = [14, 128], strides = [1, 1]} : vector<32x128xf32> to vector<14x128xf32>
    %25 = tpu.concatenate %23, %22, %24, %22 in 0 : vector<14x128xf32>, vector<2x128xf32>, vector<14x128xf32>, vector<2x128xf32> -> vector<32x128xf32>
    %26 = tpu.concatenate %21, %17, %25 in 1 : vector<32x128xf32>, vector<32x128xf32>, vector<32x128xf32> -> vector<32x384xf32>
    %27 = arith.truncf %26 : vector<32x384xf32> to vector<32x384xbf16>
    %c0_10 = arith.constant 0 : index
    %c0_11 = arith.constant 0 : index
    %28 = vector.load %arg4[%c0_10, %c0_11] : memref<384x128xbf16, #tpu.memory_space<vmem>>, vector<384x128xbf16>
    %cst_12 = arith.constant dense<0.000000e+00> : vector<32x128xf32>
    %29 = tpu.matmul %27, %28, %cst_12 {dimension_numbers = #tpu.dot_dimension_numbers<[1], [0], [0], [1], [0, 0, 1, 1], [], []>} : vector<32x384xbf16>, vector<384x128xbf16>, vector<32x128xf32> -> vector<32x128xf32>
    %c0_13 = arith.constant 0 : index
    %c0_14 = arith.constant 0 : index
    %30 = vector.load %arg5[%c0_13, %c0_14] : memref<1x128xf32, #tpu.memory_space<vmem>>, vector<1x128xf32>
    %31 = vector.broadcast %30 : vector<1x128xf32> to vector<32x128xf32>
    %32 = arith.addf %29, %31 : vector<32x128xf32>
    %33 = arith.addf %32, %0 : vector<32x128xf32>
    %cst_15 = arith.constant 0.000000e+00 : f32
    %34 = vector.broadcast %cst_15 : f32 to vector<32x128xf32>
    %35 = arith.maximumf %33, %34 : vector<32x128xf32>
    %c0_16 = arith.constant 0 : index
    %c0_17 = arith.constant 0 : index
    %36 = vector.load %arg6[%c0_16, %c0_17] : memref<32x128xf32, #tpu.memory_space<vmem>>, vector<32x128xf32>
    tpu.vector_store %arg6[%c0_16, %c0_17], %35 {strides = array<i32>} : memref<32x128xf32, #tpu.memory_space<vmem>>, vector<32x128xf32>,
    return
  }
  func.func @transform_0(%arg0: i32) -> (i32, i32) {
    %c0_i32 = arith.constant 0 : i32
    %c0_i32_0 = arith.constant 0 : i32
    return %arg0, %c0_i32 : i32, i32
  }
  func.func @transform_1(%arg0: i32) -> (i32, i32) {
    %c0_i32 = arith.constant 0 : i32
    %c0_i32_0 = arith.constant 0 : i32
    %c0_i32_1 = arith.constant 0 : i32
    return %c0_i32, %c0_i32_0 : i32, i32
  }
  func.func @transform_2(%arg0: i32) -> (i32, i32) {
    %c0_i32 = arith.constant 0 : i32
    %c0_i32_0 = arith.constant 0 : i32
    %c0_i32_1 = arith.constant 0 : i32
    return %c0_i32, %c0_i32_0 : i32, i32
  }
  func.func @transform_3(%arg0: i32) -> (i32, i32) {
    %c0_i32 = arith.constant 0 : i32
    %c0_i32_0 = arith.constant 0 : i32
    %c0_i32_1 = arith.constant 0 : i32
    return %c0_i32, %c0_i32_0 : i32, i32
  }
  func.func @transform_4(%arg0: i32) -> (i32, i32) {
    %c0_i32 = arith.constant 0 : i32
    %c0_i32_0 = arith.constant 0 : i32
    %c0_i32_1 = arith.constant 0 : i32
    return %c0_i32, %c0_i32_0 : i32, i32
  }
  func.func @transform_5(%arg0: i32) -> (i32, i32) {
    %c0_i32 = arith.constant 0 : i32
    %c0_i32_0 = arith.constant 0 : i32
    return %arg0, %c0_i32 : i32, i32
  }
}

</mosaic_0001>

<bundles_post_ra>
// kernel: tpu_custom_call.1
= control target key start
LH: loop header
LB: loop body
LE: loop exit
PB: predicated region body
PF: predicated region fallthrough
CT: control target
= control target key end

     0   :  { %10 = vsyncpa [#allocation3], 0  ;;  %s1811_s0 = inlined_call_operand.hbm [shape: f32[64,128], index: 0, kind: input, shape index: {}]   ;;  %s1812_s1 = inlined_call_operand.hbm [shape: bf16[384,128], index: 1, kind: input, shape index: {}]   ;;  %s1813_s2 = inlined_call_operand.vmem [shape: f32[1,128], index: 2, kind: input, shape index: {}]   ;;  %s1814_s3 = inlined_call_operand.hbm [shape: bf16[384,128], index: 3, kind: input, shape index: {}]   ;;  %s1815_s4 = inlined_call_operand.vmem [shape: f32[1,128], index: 4, kind: input, shape index: {}]   ;;  %s1816_s5 = inlined_call_operand.hbm [shape: f32[64,128], index: 5, kind: output, shape index: {}]  }
   0x1   :  { %12 = vsyncpa [#allocation3 + $0x1], 0 }
   0x2   :  { %13 = vsyncpa [#allocation6], 0 }
   0x3   :  { %14 = vsyncpa [#allocation4], 0 }
   0x4   :  { %16 = vsyncpa [#allocation4 + $0x1], 0  ;;  %s1567_s18 = smov 0   ;;  %s1569_s19 = smov 0  }
   0x5   :  { %s1571_s20 = smov 0   ;;  %s1573_s21 = smov 0  }
   0x6 LB: > { %s1588_s22 = sadd.s32 4294967295, %s1526_s21   ;;  %s986_s23 = sadd.s32 4294967294, %s1526_s21   ;;  %s1526_s21 = sphi %s1573_s21, %s1834_s21   ;;  %s1522_s20 = sphi %s1571_s20, %s1833_s20   ;;  %s1518_s19 = sphi %s1569_s19, %s1832_s19   ;;  %s1514_s18 = sphi %s1567_s18, %s1831_s18  }
   0x7   : > { %p42_p0 = scmp.ne.s32.totalorder %s1518_s19, %s1514_s18  ;;  %p43_p1 = scmp.eq.s32.totalorder %s1588_s22, 0 }
   0x8   : > { %p150_p2 = scmp.eq.s32.totalorder %s1588_s22, 1  ;;  %p156_p3 = scmp.eq.s32.totalorder %s986_s23, 1 }
   0x9   : > { %p1597_p4 = por %p43_p1, %p42_p0  ;;  %p987_p5 = scmp.ge.s32.totalorder %s1526_s21, 1 }
   0xa   : > { %p1602_p6 = por %p156_p3, %p42_p0  ;;  %p163_p7 = scmp.lt.s32.totalorder %s1526_s21, 3 }
   0xb   : > { %s174_s28 = sshll.u32 %s1812_s1, 4  ;;  %s1528_s30 = smov [#allocation5]   ;;  %s175_s28 = int_to_ptr.hbm [resolvable:$true] %s174_s28 }
   0xc   : > { %p1610_p8 = pnand %p987_p5, %p163_p7  ;;  %s176_s6 = sshll.u32 %s1528_s30, 4  ;;  %s177_s6 = int_to_ptr.vmem [resolvable:$true] %s176_s6 }
   0xd   : > { %s191_s9 = sshll.u32 %s1814_s3, 4  ;;  %s1529_s10 = smov 64   ;;  %s192_s9 = int_to_ptr.hbm [resolvable:$true] %s191_s9 }
   0xe   : > { %p1302_p9 = pneg %p1610_p8  ;;  %s1530_s11 = smov 4  }
   0xf   : > { %s1531_s12 = smov [#allocation7]   ;;  %s1623_s14 = sadd.s32 1, %s1526_s21  }
  0x10   : > { %p1303_p10 = pnand %p1302_p9, %p43_p1  ;;  %s193_s13 = sshll.u32 %s1531_s12, 4  ;;  %s194_s13 = int_to_ptr.vmem [resolvable:$true] %s193_s13 }
  0x11   : > { %s29_s15 = sadd.s32 1, %s1522_s20  ;;  %s26_s16 = ssub.s32 %s1526_s21, %s1623_s14 }
  0x12   : > { %1305 = dma.hbm_to_vmem [thread:$0]  (!%p1303_p10), %s175_s28, 3072, %s177_s6, [#allocation6], %s1529_s10, %s1529_s10, %s1530_s11  }
  0x13   : > { %1308 = dma.hbm_to_vmem [thread:$0]  (!%p1303_p10), %s192_s9, 3072, %s194_s13, [#allocation6], %s1529_s10, %s1529_s10, %s1530_s11  }
  0x14   : > { %p36_p12 = scmp.ne.s32.totalorder %s1522_s20, %s1518_s19  ;;  %p27_p13 = scmp.eq.s32.totalorder %s26_s16, 0 }
  0x15   : > { %p37_p0 = scmp.eq.s32.totalorder %s1526_s21, 0  ;;  %p1319_p5 = scmp.lt.s32.totalorder %s1526_s21, 2 }
  0x16   : > { %p1633_p3 = por %p150_p2, %p36_p12  ;;  %s210_s26 = sand.u32 1, %s1522_s20  }
  0x17   : > { %s1639_s23 = scalar_select %p27_p13, %s1522_s20, %s29_s15  }
  0x18   : > { %p38_p7 = por %p37_p0, %p36_p12  ;;  %s991_s27 = sshll.u32 %s210_s26, 5 }
  0x19   : > { %s1224_s28 = sshll.u32 %s1526_s21, 5  ;;  %s214_s8 = scalar_lea.vmem [#allocation2], %s991_s27 }
  0x1a   : > { %s219_s7 = scalar_lea.hbm %s1811_s0, %s1224_s28  ;;  %s222_s9 = sshll.u32 %s214_s8, 4  ;;  %s223_s9 = int_to_ptr.vmem [resolvable:$true] %s222_s9 }
  0x1b   : > { %s220_s10 = sshll.u32 %s219_s7, 4  ;;  %p1646_p2 = pnand %p1319_p5, %p38_p7  ;;  %s221_s10 = int_to_ptr.hbm [resolvable:$true] %s220_s10 }
  0x1c   : > { %s211_s12 = scalar_lea.sflag [#allocation3], %s210_s26  ;;  %s1426_s13 = sshra.s32 %s221_s10, 4  ;;  %s1427_s13 = int_to_ptr.hbm [resolvable:$true] %s1426_s13 }
  0x1d   : > { %s1428_s15 = scalar_lea.hbm %s1427_s13, 32  ;;  %p1430_p10 = pneg %p1646_p2 }
  0x1e   : > { %p1429_p9 = scmp.ne.s32.totalorder %s1427_s13, %s1428_s15  ;;  %s1433_s28 = scalar_lea.hbm %s1811_s0, 64 }
  0x1f   : > { %p1434_p0 = scmp.lt.s32.totalorder %s1427_s13, %s1811_s0  ;;  %p1435_p5 = scmp.lt.s32.totalorder %s1433_s28, %s1428_s15 }
  0x20   : > { %p1431_p12 = pnand %p1430_p10, %p1429_p9 }
  0x21   : > { %p1436_p7 = por %p1435_p5, %p1434_p0 }
  0x22   : > { %p1432_p13 = pneg %p1431_p12 }
  0x24   : > { %p1437_p11 = pnand %p1436_p7, %p1432_p13 }
  0x26   : > { %1440 = shalt.err (!%p1437_p11)
}
  0x27   : > { %s1532_s26 = smov 128   ;;  %s1533_s7 = smov 8  }
  0x28   : > { %1312 = dma.hbm_to_vmem [thread:$0]  (!%p1646_p2), %s221_s10, 512, %s223_s9, %s211_s12, %s1532_s26, %s1532_s26, %s1533_s7  }
  0x29   : > { %234 = sbr.rel (%p1610_p8) target bundleno = 414 (0x19e), region = 40  ;;  %s1663_s8 = sand.u32 (!%p1610_p8), 1, %s1518_s19  }
  0x2a   : > { %s995_s13 = sshll.u32 (!%p1610_p8), %s1663_s8, 5  ;;  %s237_s15 = scalar_lea.sflag (!%p1610_p8), [#allocation3], %s1663_s8 }
  0x2b   : > { %s1669_s16 = scalar_lea.vmem (!%p1610_p8), [#allocation2], %s995_s13 }
  0x2e   : > { %1501 = dma.done.wait (%p1597_p4), %s237_s15, 512  }
  0x2f   : > { %1503 = vsyncadd (%p1597_p4), %s237_s15, 4294966784 }
  0x30   : > { %1505 = dma.done.wait (%p43_p1), [#allocation6], 6144  }
  0x31   : > { %1507 = vsyncadd (%p43_p1), [#allocation6], 4294961152  ;;  %v1232_v0 = vld [vmem:[#allocation5 + $0x38] sm:$0xff]  ;;  %v1231_v3 = vld [vmem:[#allocation5 + $0x30] sm:$0xff]  ;;  %vm286_vm0 = vcmask 1040384   ;;  %vm301_vm1 = vcmask 1046528  }
  0x32   : > { %v1240_v1 = vld [vmem:[#allocation5 + $0x78] sm:$0xff]  ;;  %516 = vmatpush.bf16.msra.mxu0 %v1232_v0  ;;  %v1239_v4 = vld [vmem:[#allocation5 + $0x70] sm:$0xff]  ;;  %v1230_v6 = vld [vmem:[#allocation5 + $0x28] sm:$0xff]  ;;  %vm1534_vm3 = vmmov 1   ;;  %vm579_vm6 = vcmask 1041408   ;;  %vm594_vm8 = vcmask 1045504  }
  0x33   : > { %v1248_v2 = vld [vmem:[#allocation5 + $0xb8] sm:$0xff]  ;;  %535 = vmatpush.bf16.msra.mxu1 %v1240_v1  ;;  %v1247_v5 = vld [vmem:[#allocation5 + $0xb0] sm:$0xff]  ;;  %v1238_v7 = vld [vmem:[#allocation5 + $0x68] sm:$0xff]  ;;  %s1768_s11 = scalar_lea.vmem [#allocation8], %s995_s13  ;;  %s1273_s12 = sshll.u32 %s1588_s22, 5 }
  0x34   : > { %554 = vmatpush.bf16.msra.mxu2 %v1248_v2  ;;  %v1246_v8 = vld [vmem:[#allocation5 + $0xa8] sm:$0xff]  ;;  %v1229_v9 = vld [vmem:[#allocation5 + $0x20] sm:$0xff]  ;;  %v1228_v12 = vld [vmem:[#allocation5 + $0x18] sm:$0xff]  ;;  %s890_s30 = scalar_lea.hbm %s1816_s5, %s1273_s12  ;;  %s891_s6 = sshll.u32 %s1768_s11, 4  ;;  %s892_s6 = int_to_ptr.vmem [resolvable:$true] %s891_s6 }
  0x35   : > { %v1237_v10 = vld [vmem:[#allocation5 + $0x60] sm:$0xff]  ;;  %v1236_v13 = vld [vmem:[#allocation5 + $0x58] sm:$0xff]  ;;  %v1227_v15 = vld [vmem:[#allocation5 + $0x10] sm:$0xff]  ;;  %s893_s26 = sshll.u32 %s890_s30, 4  ;;  %s879_s22 = scalar_lea.sflag [#allocation4], %s1663_s8  ;;  %s894_s26 = int_to_ptr.hbm [resolvable:$true] %s893_s26 }
  0x36   : > { %517 = vmatpush.bf16.msra.mxu0 %v1231_v3  ;;  %v1245_v11 = vld [vmem:[#allocation5 + $0xa0] sm:$0xff]  ;;  %v1244_v14 = vld [vmem:[#allocation5 + $0x98] sm:$0xff]  ;;  %v1235_v16 = vld [vmem:[#allocation5 + $0x50] sm:$0xff]  ;;  %s1470_s7 = sshra.s32 %s894_s26, 4  ;;  %s1476_s24 = scalar_lea.hbm %s1816_s5, 64  ;;  %s1471_s7 = int_to_ptr.hbm [resolvable:$true] %s1470_s7 }
  0x37   : > { %536 = vmatpush.bf16.msra.mxu1 %v1239_v4  ;;  %v1256_v17 = vld [vmem:[#allocation7 + $0x38] sm:$0xff]  ;;  %v1243_v18 = vld [vmem:[#allocation5 + $0x90] sm:$0xff]  ;;  %v1680_v19 = vld [vmem:[%s1669_s16] sm:$0xff]  ;;  %s1472_s13 = scalar_lea.hbm %s1471_s7, 32  ;;  %p1477_p11 = scmp.lt.s32.totalorder %s1471_s7, %s1816_s5 }
  0x38   : > { %555 = vmatpush.bf16.msra.mxu2 %v1247_v5  ;;  %v1683_v20 = vld [vmem:[%s1669_s16 + $0x8] sm:$0xff]  ;;  %809 = vmatpush.bf16.msra.mxu3 %v1256_v17  ;;  %v1255_v21 = vld [vmem:[#allocation7 + $0x30] sm:$0xff]  ;;  %v287_v24 = vrot.slane %v1680_v19, 7  ;;  %v302_v27 = vrot.slane %v1680_v19, 1  ;;  %v1225_v29 = vld [vmem:[#allocation5] sm:$0xff]  ;;  %p1473_p1 = scmp.ne.s32.totalorder %s1471_s7, %s1472_s13  ;;  %p1478_p2 = scmp.lt.s32.totalorder %s1476_s24, %s1472_s13 }
  0x39   : > { %v1226_v22 = vld [vmem:[#allocation5 + $0x8] sm:$0xff]  ;;  %v288_v25 = vrot.slane %v1683_v20, 7  ;;  %v303_v28 = vrot.slane %v1683_v20, 1  ;;  %v1233_v30 = vld [vmem:[#allocation5 + $0x40] sm:$0xff]  ;;  %vm1095_vm2 = vmneg %vm286_vm0  ;;  %v315_v37 = vpack.c.bf16 %v1683_v20, %v1680_v19 }
  0x3a   : > { %518 = vmatpush.bf16.msra.mxu0 %v1230_v6  ;;  %v1234_v23 = vld [vmem:[#allocation5 + $0x48] sm:$0xff]  ;;  %v1241_v32 = vld [vmem:[#allocation5 + $0x80] sm:$0xff]  ;;  %v1264_v34 = vld [vmem:[#allocation7 + $0x78] sm:$0xff]  ;;  %p1474_p4 = pnand %p1473_p1, %p1633_p3  ;;  %p1479_p9 = por %p1478_p2, %p1477_p11 }
  0x3b   : > { %537 = vmatpush.bf16.msra.mxu1 %v1238_v7  ;;  %v1242_v26 = vld [vmem:[#allocation5 + $0x88] sm:$0xff]  ;;  %v289_v31 = vsel %vm286_vm0, %v287_v24, %v288_v25  ;;  %v304_v33 = vsel %vm301_vm1, %v302_v27, %v303_v28  ;;  %v1692_v35 = vld [vmem:[#allocation7 + $0xb8] sm:$0xff]  ;;  %vm1697_vm4 = vmpackc.low %vm1534_vm3, %vm1095_vm2 }
  0x3c   : > { %556 = vmatpush.bf16.msra.mxu2 %v1246_v8  ;;  %810 = vmatpush.bf16.msra.mxu3 %v1255_v21  ;;  %v1097_v36 = vpack.c.bf16 %v289_v31, %v287_v24  ;;  %v1104_v39 = vpack.c.bf16 %v303_v28, %v304_v33  ;;  %vm1703_vm5 = vmpackc.low %vm301_vm1, %vm1534_vm3  ;;  %v1263_v41 = vld [vmem:[#allocation7 + $0x70] sm:$0xff]  ;;  %v1718_v44 = vld [vmem:[%s1669_s16 + $0x18] sm:$0xff]  ;;  %p1475_p8 = pneg %p1474_p4 }
  0x3d   : > { %v1708_v42 = vld [vmem:[#allocation7 + $0xb0] sm:$0xff]  ;;  %v1262_v45 = vld [vmem:[#allocation7 + $0x68] sm:$0xff]  ;;  %v295_v47 = vrot.slane %v1718_v44, 7  ;;  %v308_v49 = vrot.slane %v1718_v44, 1  ;;  %v1261_v57 = vld [vmem:[#allocation7 + $0x60] sm:$0xff] }
  0x3e   : > { %519 = vmatpush.bf16.msra.mxu0 %v1229_v9  ;;  %v1715_v43 = vld [vmem:[%s1669_s16 + $0x10] sm:$0xff]  ;;  %v1254_v55 = vld [vmem:[#allocation7 + $0x28] sm:$0xff]  ;;  %v1253_v58 = vld [vmem:[#allocation7 + $0x20] sm:$0xff]  ;;  %p1480_p10 = pnand %p1479_p9, %p1475_p8 }
  0x3f   : > { %538 = vmatpush.bf16.msra.mxu1 %v1237_v10  ;;  %v294_v46 = vrot.slane %v1715_v43, 7  ;;  %v307_v48 = vrot.slane %v1715_v43, 1  ;;  %v318_v53 = vpack.c.bf16 %v1718_v44, %v1715_v43  ;;  %v1270_v56 = vld [vmem:[#allocation7 + $0xa8] sm:$0xff]  ;;  %v1269_v59 = vld [vmem:[#allocation7 + $0xa0] sm:$0xff]  ;;  %v1260_v60 = vld [vmem:[#allocation7 + $0x58] sm:$0xff] }
  0x40   : > { %557 = vmatpush.bf16.msra.mxu2 %v1245_v11  ;;  %811 = vmatpush.bf16.msra.mxu3 %v1254_v55  ;;  %v1252_v61 = vld [vmem:[#allocation7 + $0x18] sm:$0xff]  ;;  %v1259_v63 = vld [vmem:[#allocation7 + $0x50] sm:$0xff]  ;;  %v1258_v2 = vld [vmem:[#allocation7 + $0x48] sm:$0xff] }
  0x41   : > { %v296_v50 = vsel %vm286_vm0, %v294_v46, %v295_v47  ;;  %v309_v51 = vsel %vm301_vm1, %v307_v48, %v308_v49  ;;  %v1268_v62 = vld [vmem:[#allocation7 + $0x98] sm:$0xff]  ;;  %v1251_v0 = vld [vmem:[#allocation7 + $0x10] sm:$0xff]  ;;  %v1250_v3 = vld [vmem:[#allocation7 + $0x8] sm:$0xff] }
  0x42   : > { %520 = vmatpush.bf16.msra.mxu0 %v1228_v12  ;;  %v1101_v52 = vpack.c.bf16 %v296_v50, %v294_v46  ;;  %v1107_v54 = vpack.c.bf16 %v308_v49, %v309_v51  ;;  %v1267_v1 = vld [vmem:[#allocation7 + $0x90] sm:$0xff]  ;;  %v1266_v4 = vld [vmem:[#allocation7 + $0x88] sm:$0xff]  ;;  %v1257_v5 = vld [vmem:[#allocation7 + $0x40] sm:$0xff] }
  0x43   : > { %539 = vmatpush.bf16.msra.mxu1 %v1236_v13  ;;  %v1249_v6 = vld [vmem:[#allocation7] sm:$0xff]  ;;  %vm1205_vm7 = vmneg %vm579_vm6 }
  0x44   : > { %558 = vmatpush.bf16.msra.mxu2 %v1244_v14  ;;  %812 = vmatpush.bf16.msra.mxu3 %v1253_v58  ;;  %v1265_v7 = vld [vmem:[#allocation7 + $0x80] sm:$0xff]  ;;  %vm1740_vm9 = vmpackc.low %vm1534_vm3, %vm1205_vm7 }
  0x45   : > { %v1364_v8 = vld [vmem:[%s1813_s2] ss:$0 sm:$0xff]  ;;  %vm1748_vm10 = vmpackc.low %vm594_vm8, %vm1534_vm3 }
  0x46   : > { %521 = vmatpush.bf16.msra.mxu0 %v1227_v15 }
  0x47   : > { %540 = vmatpush.bf16.msra.mxu1 %v1235_v16 }
  0x48   : > { %559 = vmatpush.bf16.msra.mxu2 %v1243_v18  ;;  %813 = vmatpush.bf16.msra.mxu3 %v1252_v61  ;;  %v1365_v61 = vld [vmem:[%s1815_s4] ss:$0 sm:$0xff] }
  0x4a   : > { %522 = vmatpush.bf16.msra.mxu0 %v1226_v22 }
  0x4b   : > { %541 = vmatpush.bf16.msra.mxu1 %v1234_v23 }
  0x4c   : > { %560 = vmatpush.bf16.msra.mxu2 %v1242_v26  ;;  %814 = vmatpush.bf16.msra.mxu3 %v1251_v0 }
  0x4e   : > { %523 = vmatpush.bf16.msra.mxu0 %v1225_v29 }
  0x4f   : > { %542 = vmatpush.bf16.msra.mxu1 %v1233_v30 }
  0x50   : > { %561 = vmatpush.bf16.msra.mxu2 %v1241_v32  ;;  %815 = vmatpush.bf16.msra.mxu3 %v1250_v3 }
  0x51   : > { %1098 = vmatmul.msk.bf16.vlgmr.msra.gmra.mxu0 %vm1697_vm4, %v1097_v36 }
  0x52   : > { %828 = vmatpush.bf16.msrb.mxu0 %v1264_v34  ;;  %543 = vmatmul.bf16.vlgmr.msra.gmra.mxu1 %v315_v37 }
  0x53   : > { %847 = vmatpush.bf16.msrb.mxu1 %v1692_v35  ;;  %1105 = vmatmul.msk.bf16.vlgmr.msra.gmra.mxu2 %vm1703_vm5, %v1104_v39 }
  0x54   : > { %1274 = vmatpush.bf16.msrb.mxu2 %v1264_v34  ;;  %816 = vmatpush.bf16.msra.mxu3 %v1249_v6 }
  0x56   : > { %829 = vmatpush.bf16.msrb.mxu0 %v1263_v41 }
  0x57   : > { %848 = vmatpush.bf16.msrb.mxu1 %v1708_v42 }
  0x58   : > { %1275 = vmatpush.bf16.msrb.mxu2 %v1263_v41  ;;  %1282 = vmatpush.bf16.msrb.mxu3 %v1692_v35 }
  0x5a   : > { %830 = vmatpush.bf16.msrb.mxu0 %v1262_v45 }
  0x5b   : > { %849 = vmatpush.bf16.msrb.mxu1 %v1270_v56 }
  0x5c   : > { %1276 = vmatpush.bf16.msrb.mxu2 %v1262_v45  ;;  %1283 = vmatpush.bf16.msrb.mxu3 %v1708_v42 }
  0x5e   : > { %831 = vmatpush.bf16.msrb.mxu0 %v1261_v57 }
  0x5f   : > { %850 = vmatpush.bf16.msrb.mxu1 %v1269_v59 }
  0x60   : > { %1277 = vmatpush.bf16.msrb.mxu2 %v1261_v57  ;;  %1284 = vmatpush.bf16.msrb.mxu3 %v1270_v56 }
  0x61   : > { %1102 = vmatmul.msk.bf16.gmra.mxu0 %vm1697_vm4, %v1101_v52 }
  0x62   : > { %548 = vmatmul.bf16.gmra.mxu1 %v318_v53  ;;  %832 = vmatpush.bf16.msrb.mxu0 %v1260_v60 }
  0x63   : > { %1108 = vmatmul.msk.bf16.gmra.mxu2 %vm1703_vm5, %v1107_v54  ;;  %851 = vmatpush.bf16.msrb.mxu1 %v1268_v62 }
  0x64   : > { %1278 = vmatpush.bf16.msrb.mxu2 %v1260_v60  ;;  %1285 = vmatpush.bf16.msrb.mxu3 %v1269_v59 }
  0x66   : > { %833 = vmatpush.bf16.msrb.mxu0 %v1259_v63 }
  0x67   : > { %852 = vmatpush.bf16.msrb.mxu1 %v1267_v1 }
  0x68   : > { %1279 = vmatpush.bf16.msrb.mxu2 %v1259_v63  ;;  %1286 = vmatpush.bf16.msrb.mxu3 %v1268_v62 }
  0x6a   : > { %834 = vmatpush.bf16.msrb.mxu0 %v1258_v2 }
  0x6b   : > { %853 = vmatpush.bf16.msrb.mxu1 %v1266_v4 }
  0x6c   : > { %1280 = vmatpush.bf16.msrb.mxu2 %v1258_v2  ;;  %1287 = vmatpush.bf16.msrb.mxu3 %v1267_v1 }
  0x6e   : > { %835 = vmatpush.bf16.msrb.mxu0 %v1257_v5 }
  0x6f   : > { %854 = vmatpush.bf16.msrb.mxu1 %v1265_v7 }
  0x70   : > { %1281 = vmatpush.bf16.msrb.mxu2 %v1257_v5  ;;  %1288 = vmatpush.bf16.msrb.mxu3 %v1266_v4 }
  0x74   : > { %1289 = vmatpush.bf16.msrb.mxu3 %v1265_v7 }
  0xce   : > { %v525_v9 = vpop.f32.mrf.mxu0 }
  0xcf   : > { %v544_v10 = vpop.f32.mrf.mxu1  ;;  %v526_v11 = vadd.f32 %v1364_v8, %v525_v9 }
  0xd1   : > { %v545_v12 = vadd.f32 %v544_v10, %v526_v11 }
  0xd6   : > { %v563_v13 = vpop.f32.mrf.mxu2  ;;  %v527_v14 = vpop.f32.mrf.mxu0 }
  0xd7   : > { %v546_v15 = vpop.f32.mrf.mxu1  ;;  %v528_v16 = vadd.f32 %v1364_v8, %v527_v14  ;;  %v564_v17 = vadd.f32 %v563_v13, %v545_v12 }
  0xd9   : > { %v547_v18 = vadd.f32 %v546_v15, %v528_v16  ;;  %v573_v21 = vmax.f32 %v564_v17, 0.0 }
  0xdb   : > { %v580_v26 = vrot.slane %v573_v21, 6  ;;  %v595_v27 = vrot.slane %v573_v21, 2 }
  0xde   : > { %v565_v22 = vpop.f32.mrf.mxu2  ;;  %v530_v24 = vpop.f32.mrf.mxu0 }
  0xdf   : > { %v566_v23 = vadd.f32 %v565_v22, %v547_v18  ;;  %v549_v28 = vpop.f32.mrf.mxu1  ;;  %v531_v31 = vadd.f32 %v1364_v8, %v530_v24 }
  0xe1   : > { %v574_v25 = vmax.f32 %v566_v23, 0.0  ;;  %v550_v40 = vadd.f32 %v549_v28, %v531_v31 }
  0xe3   : > { %v581_v29 = vrot.slane %v574_v25, 6  ;;  %v596_v30 = vrot.slane %v574_v25, 2  ;;  %v608_v32 = vpack.c.bf16 %v574_v25, %v573_v21 }
  0xe5   : > { %836 = vmatmul.bf16.vlgmr.msrb.gmra.mxu0 %v608_v32  ;;  %v582_v34 = vsel %vm579_vm6, %v580_v26, %v581_v29  ;;  %v597_v35 = vsel %vm594_vm8, %v595_v27, %v596_v30 }
  0xe6   : > { %v568_v37 = vpop.f32.mrf.mxu2  ;;  %v1207_v38 = vpack.c.bf16 %v582_v34, %v580_v26  ;;  %v1214_v39 = vpack.c.bf16 %v596_v30, %v597_v35  ;;  %v532_v41 = vpop.f32.mrf.mxu0 }
  0xe7   : > { %v533_v42 = vadd.f32 %v1364_v8, %v532_v41  ;;  %v569_v45 = vadd.f32 %v568_v37, %v550_v40  ;;  %v551_v46 = vpop.f32.mrf.mxu1 }
  0xe8   : > { %1208 = vmatmul.msk.bf16.vlgmr.msra.gmra.mxu3 %vm1740_vm9, %v1207_v38  ;;  %1215 = vmatmul.msk.bf16.vlgmr.msrb.gmra.mxu1 %vm1748_vm10, %v1214_v39 }
  0xe9   : > { %v552_v47 = vadd.f32 %v551_v46, %v533_v42  ;;  %v575_v49 = vmax.f32 %v569_v45, 0.0 }
  0xeb   : > { %v587_v52 = vrot.slane %v575_v49, 6  ;;  %v600_v58 = vrot.slane %v575_v49, 2 }
  0xee   : > { %v570_v48 = vpop.f32.mrf.mxu2 }
  0xef   : > { %v571_v50 = vadd.f32 %v570_v48, %v552_v47 }
  0xf1   : > { %v576_v51 = vmax.f32 %v571_v50, 0.0 }
  0xf3   : > { %v588_v53 = vrot.slane %v576_v51, 6  ;;  %v611_v54 = vpack.c.bf16 %v576_v51, %v575_v49  ;;  %v601_v57 = vrot.slane %v576_v51, 2 }
  0xf5   : > { %841 = vmatmul.bf16.vlgmr.msrb.gmra.mxu2 %v611_v54  ;;  %v589_v55 = vsel %vm579_vm6, %v587_v52, %v588_v53  ;;  %v602_v59 = vsel %vm594_vm8, %v600_v58, %v601_v57 }
  0xf6   : > { %v1211_v56 = vpack.c.bf16 %v589_v55, %v587_v52  ;;  %v1217_v60 = vpack.c.bf16 %v601_v57, %v602_v59 }
  0xf8   : > { %1212 = vmatmul.msk.bf16.gmra.mxu3 %vm1740_vm9, %v1211_v56 }
 0x108   : > { %1218 = vmatmul.msk.bf16.vlgmr.msrb.gmra.mxu3 %vm1748_vm10, %v1217_v60 }
 0x162   : > { %v837_v62 = vpop.f32.mrf.mxu0 }
 0x165   : > { %v856_v1 = vpop.f32.mrf.mxu1 }
 0x16a   : > { %v839_v8 = vpop.f32.mrf.mxu0 }
 0x16b   : > { %v818_v63 = vpop.f32.mrf.mxu3 }
 0x16c   : > { %v819_v0 = vadd.f32 %v1365_v61, %v818_v63 }
 0x16d   : > { %v858_v10 = vpop.f32.mrf.mxu1 }
 0x16e   : > { %v838_v2 = vadd.f32 %v837_v62, %v819_v0 }
 0x170   : > { %v857_v3 = vadd.f32 %v856_v1, %v838_v2 }
 0x172   : > { %v866_v4 = vadd.f32 %v857_v3, %v1680_v19 }
 0x173   : > { %v820_v5 = vpop.f32.mrf.mxu3 }
 0x174   : > { %v870_v6 = vmax.f32 %v866_v4, 0.0  ;;  %v821_v7 = vadd.f32 %v1365_v61, %v820_v5 }
 0x176   : > { %874 = vst [vmem:[%s1768_s11] sm:$0xff] %v870_v6  ;;  %v840_v9 = vadd.f32 %v839_v8, %v821_v7 }
 0x178   : > { %v859_v11 = vadd.f32 %v858_v10, %v840_v9  ;;  %v842_v16 = vpop.f32.mrf.mxu2 }
 0x17a   : > { %v867_v12 = vadd.f32 %v859_v11, %v1683_v20 }
 0x17b   : > { %v823_v13 = vpop.f32.mrf.mxu3 }
 0x17c   : > { %v871_v14 = vmax.f32 %v867_v12, 0.0  ;;  %v824_v15 = vadd.f32 %v1365_v61, %v823_v13 }
 0x17e   : > { %875 = vst [vmem:[%s1768_s11 + $0x8] sm:$0xff] %v871_v14  ;;  %v843_v17 = vadd.f32 %v842_v16, %v824_v15 }
 0x180   : > { %v844_v25 = vpop.f32.mrf.mxu2 }
 0x183   : > { %v825_v19 = vpop.f32.mrf.mxu3 }
 0x184   : > { %v826_v22 = vadd.f32 %v1365_v61, %v825_v19 }
 0x186   : > { %v845_v20 = vadd.f32 %v844_v25, %v826_v22 }
 0x18b   : > { %v861_v18 = vpop.f32.mrf.mxu3 }
 0x18c   : > { %v862_v21 = vadd.f32 %v861_v18, %v843_v17 }
 0x18e   : > { %v868_v23 = vadd.f32 %v862_v21, %v1715_v43 }
 0x190   : > { %v872_v24 = vmax.f32 %v868_v23, 0.0 }
 0x192   : > { %876 = vst [vmem:[%s1768_s11 + $0x10] sm:$0xff] %v872_v24 }
 0x193   : > { %v863_v26 = vpop.f32.mrf.mxu3 }
 0x194   : > { %v864_v27 = vadd.f32 %v863_v26, %v845_v20 }
 0x196   : > { %v869_v28 = vadd.f32 %v864_v27, %v1718_v44 }
 0x198   : > { %v873_v43 = vmax.f32 %v869_v28, 0.0 }
 0x19a   : > { %877 = vst [vmem:[%s1768_s11 + $0x18] sm:$0xff] %v873_v43 }
 0x19b   : > { %1483 = shalt.err (!%p1480_p10)
}
 0x19c   : > { %s1535_s8 = smov 128   ;;  %s1536_s10 = smov 8  }
 0x19d   : > { %1300 = dma.vmem_to_hbm [thread:$0]  (%p1633_p3), %s892_s6, 512, %s894_s26, %s879_s22, %s1535_s8, %s1535_s8, %s1536_s10  }
 0x19e PF: > { %s908_s11 = sand.u32 1, %s1514_s18   ;;  %p1830_p12 = scmp.ge.s32.totalorder %s1526_s21, 2 }
 0x19f   : > { %s909_s12 = scalar_lea.sflag [#allocation4], %s908_s11 }
 0x1a0   : > { %p1314_p13 = pnand %p1830_p12, %p1602_p6 }
 0x1a2   : > { %p1315_p0 = pneg %p1314_p13 }
 0x1a4   : > { %1509 = dma.done.wait (%p1315_p0), %s909_s12, 512  }
 0x1a5   : > { %1511 = vsyncadd (%p1315_p0), %s909_s12, 4294966784  ;;  %p19_p5 = scmp.ge.s32.totalorder %s1623_s14, 4   ;;  %s1831_s18 = smov %s1518_s19 }
 0x1a6   : > { %s1832_s19 = smov %s1522_s20  ;;  %s1833_s20 = smov %s1639_s23 }
 0x1a7   : > { %s1834_s21 = smov %s1623_s14  ;;  %21 = sbr.rel (!%p19_p5) target bundleno = 6 (0x6), region = 93 }
 0x1ac   :  { %915 = vsyncpa [#allocation3], 1 }
 0x1ad   :  { %917 = vsyncpa [#allocation3 + $0x1], 1 }
 0x1ae   :  { %918 = vsyncpa [#allocation6], 1 }
 0x1af   :  { %919 = vsyncpa [#allocation4], 1 }
 0x1b0   :  { %921 = vsyncpa [#allocation4 + $0x1], 1 }

</bundles_post_ra>
